<compile_context>
chip_gen: v5e
topology: v5e:2x2
jax: 0.10.0
libtpu: 0.0.40
codegen_flags: <defaults>
</compile_context>

<pallas_src>
import jax
import jax.numpy as jnp
from jax.experimental import pallas as pl
from jax.experimental.pallas import tpu as pltpu

IN_FEATURES = 10
OUT_FEATURES = 5

_XLA_CUTOFF = 256      # below this, plain XLA beats any custom call
_MAX_BLOCK_N = 8192    # ~1.5 MiB of double-buffered scratch (see header math)


def linear_t_kernel(w_ref, b_ref, x_ref, o_ref):
    # y^T tile = W @ x^T tile  (MXU, f32 acc) + bias broadcast over lanes (VPU).
    acc = jnp.dot(w_ref[...], x_ref[...], preferred_element_type=jnp.float32)
    o_ref[...] = (acc + b_ref[...]).astype(o_ref.dtype)


def _round_up(v, m):
    return ((v + m - 1) // m) * m


def _choose_block_n(n):
    """Lane-tile size: big enough to amortize ~0.35us/step, >=2 steps for v7x."""
    if n <= 512:
        return n  # single full-extent block (block dim == array dim is legal)
    half = _round_up((n + 1) // 2, 128)
    return min(half, _MAX_BLOCK_N)


def _forward_lane_dense(x, w, b_col):
    """x: (N, 10) -> y: (N, 5) via y^T = W @ x^T + b, batch on lanes."""
    n = x.shape[0]
    block_n = _choose_block_n(n)
    x_t = x.T  # (10, N): wrapper-side layout plumbing (cheap XLA transpose)
    y_t = pl.pallas_call(
        linear_t_kernel,
        out_shape=jax.ShapeDtypeStruct((OUT_FEATURES, n), x.dtype),
        grid=(pl.cdiv(n, block_n),),
        in_specs=[
            # Constant index_maps -> W and b stay VMEM-resident, never re-DMA'd.
            pl.BlockSpec((OUT_FEATURES, IN_FEATURES), lambda i: (0, 0)),
            pl.BlockSpec((OUT_FEATURES, 1), lambda i: (0, 0)),
            # x^T tile: 10 sublanes (== full dim), block_n lanes.
            pl.BlockSpec((IN_FEATURES, block_n), lambda i: (0, i)),
        ],
        # Lane-dense output: last dim is a large multiple of 128 -> unmasked vst.
        out_specs=pl.BlockSpec((OUT_FEATURES, block_n), lambda i: (0, i)),
        compiler_params=pltpu.CompilerParams(
            # Batch columns are independent: shard across v7x's 2 TCs.
            dimension_semantics=("parallel",),
        ),
    )(w, b_col, x_t)
    return y_t.T


def toy_model_forward(x, w, b):
    """x: (N, 10) f32, w: (5, 10) f32 (PyTorch layout), b: (5,) f32 -> (N, 5)."""
    n = x.shape[0]
    if n <= _XLA_CUTOFF:
        # Custom-call overhead dominates an ~800-FLOP problem; let XLA fuse it.
        return x @ w.T + b.reshape(1, OUT_FEATURES)
    return _forward_lane_dense(x, w, b.reshape(OUT_FEATURES, 1))


def reference_forward(x, w, b):
    return x @ w.T + b.reshape(1, OUT_FEATURES)


if __name__ == "__main__":
    key = jax.random.PRNGKey(0)
    k_x, k_w, k_b, k_x2, k_x3 = jax.random.split(key, 5)

    # nn.Linear(10, 5) default init: uniform(-1/sqrt(fan_in), 1/sqrt(fan_in)).
    bound = 1.0 / jnp.sqrt(jnp.float32(IN_FEATURES))
    w = jax.random.uniform(
        k_w, (OUT_FEATURES, IN_FEATURES), jnp.float32, -bound, bound
    )  # PyTorch stores W as (out, in)
    b = jax.random.uniform(k_b, (OUT_FEATURES,), jnp.float32, -bound, bound)

    # --- tiny batch (matches the test's ToyModel usage) -> XLA fast path ---
    x_small = jax.random.normal(k_x, (8, IN_FEATURES), jnp.float32)
    y_small = jax.block_until_ready(toy_model_forward(x_small, w, b))
    assert y_small.shape == (8, OUT_FEATURES)
    assert jnp.allclose(
        y_small, reference_forward(x_small, w, b), atol=1e-5, rtol=1e-5
    )

    # --- scaled batch -> lane-dense Pallas path, 2 grid steps (v7x: both TCs) ---
    x_big = jax.random.normal(k_x2, (2048, IN_FEATURES), jnp.float32)
    y_big = jax.block_until_ready(toy_model_forward(x_big, w, b))
    assert y_big.shape == (2048, OUT_FEATURES)
    assert jnp.allclose(
        y_big, reference_forward(x_big, w, b), atol=1e-5, rtol=1e-5
    )

    # --- ragged tail (N not a multiple of the block) -> masked final writeback ---
    x_rag = jax.random.normal(k_x3, (2050, IN_FEATURES), jnp.float32)
    y_rag = jax.block_until_ready(toy_model_forward(x_rag, w, b))
    assert y_rag.shape == (2050, OUT_FEATURES)
    assert jnp.allclose(
        y_rag, reference_forward(x_rag, w, b), atol=1e-5, rtol=1e-5
    )

    print("KERNEL_OK")
</pallas_src>

<mosaic_0001>
module attributes {stable_mosaic.version = 11 : i64} {
  func.func @linear_t_kernel(%arg0: i32, %arg1: memref<5x10xf32, #tpu.memory_space<vmem>>, %arg2: memref<5x1xf32, #tpu.memory_space<vmem>>, %arg3: memref<10x1024xf32, #tpu.memory_space<vmem>>, %arg4: memref<5x1024xf32, #tpu.memory_space<vmem>>) attributes {dimension_semantics = [#tpu.dimension_semantics<parallel>], iteration_bounds = array<i64: 2>, scalar_prefetch = 0 : i64, scratch_operands = 0 : i64, tpu.core_type = #tpu.core_type<tc>, window_params = [{pipeline_mode = #tpu.pipeline_mode<synchronous>, transform_indices = @transform_0, window_bounds = array<i64: 5, 10>}, {pipeline_mode = #tpu.pipeline_mode<synchronous>, transform_indices = @transform_1, window_bounds = array<i64: 5, 1>}, {transform_indices = @transform_2, window_bounds = array<i64: 10, 1024>}, {transform_indices = @transform_3, window_bounds = array<i64: 5, 1024>}]} {
    %c0 = arith.constant 0 : index
    %c0_0 = arith.constant 0 : index
    %0 = vector.load %arg1[%c0, %c0_0] : memref<5x10xf32, #tpu.memory_space<vmem>>, vector<5x10xf32>
    %c0_1 = arith.constant 0 : index
    %c0_2 = arith.constant 0 : index
    %1 = vector.load %arg3[%c0_1, %c0_2] : memref<10x1024xf32, #tpu.memory_space<vmem>>, vector<10x1024xf32>
    %cst = arith.constant dense<0.000000e+00> : vector<5x1024xf32>
    %2 = tpu.matmul %0, %1, %cst {dimension_numbers = #tpu.dot_dimension_numbers<[1], [0], [0], [1], [0, 0, 1, 1], [], []>} : vector<5x10xf32>, vector<10x1024xf32>, vector<5x1024xf32> -> vector<5x1024xf32>
    %c0_3 = arith.constant 0 : index
    %c0_4 = arith.constant 0 : index
    %3 = vector.load %arg2[%c0_3, %c0_4] : memref<5x1xf32, #tpu.memory_space<vmem>>, vector<5x1xf32>
    %4 = vector.broadcast %3 : vector<5x1xf32> to vector<5x1024xf32>
    %5 = arith.addf %2, %4 : vector<5x1024xf32>
    %c0_5 = arith.constant 0 : index
    %c0_6 = arith.constant 0 : index
    %6 = vector.load %arg4[%c0_5, %c0_6] : memref<5x1024xf32, #tpu.memory_space<vmem>>, vector<5x1024xf32>
    tpu.vector_store %arg4[%c0_5, %c0_6], %5 {strides = array<i32>} : memref<5x1024xf32, #tpu.memory_space<vmem>>, vector<5x1024xf32>,
    return
  }
  func.func @transform_0(%arg0: i32) -> (i32, i32) {
    %c0_i32 = arith.constant 0 : i32
    %c0_i32_0 = arith.constant 0 : i32
    %c0_i32_1 = arith.constant 0 : i32
    return %c0_i32, %c0_i32_0 : i32, i32
  }
  func.func @transform_1(%arg0: i32) -> (i32, i32) {
    %c0_i32 = arith.constant 0 : i32
    %c0_i32_0 = arith.constant 0 : i32
    %c0_i32_1 = arith.constant 0 : i32
    return %c0_i32, %c0_i32_0 : i32, i32
  }
  func.func @transform_2(%arg0: i32) -> (i32, i32) {
    %c0_i32 = arith.constant 0 : i32
    %c0_i32_0 = arith.constant 0 : i32
    return %c0_i32, %arg0 : i32, i32
  }
  func.func @transform_3(%arg0: i32) -> (i32, i32) {
    %c0_i32 = arith.constant 0 : i32
    %c0_i32_0 = arith.constant 0 : i32
    return %c0_i32, %arg0 : i32, i32
  }
}

</mosaic_0001>

<bundles_post_ra>
// kernel: tpu_custom_call.1
= control target key start
LH: loop header
LB: loop body
LE: loop exit
PB: predicated region body
PF: predicated region fallthrough
CT: control target
= control target key end

     0   :  { %8 = vsyncpa [#allocation3], 0  ;;  %s871_s0 = inlined_call_operand.vmem [shape: f32[5,10], index: 0, kind: input, shape index: {}]   ;;  %s872_s1 = inlined_call_operand.vmem [shape: f32[5,1], index: 1, kind: input, shape index: {}]   ;;  %s873_s2 = inlined_call_operand.hbm [shape: f32[10,2048], index: 2, kind: input, shape index: {}]   ;;  %s874_s3 = inlined_call_operand.hbm [shape: f32[5,2048], index: 3, kind: output, shape index: {}]  }
   0x1   :  { %10 = vsyncpa [#allocation3 + $0x1], 0 }
   0x2   :  { %11 = vsyncpa [#allocation4], 0 }
   0x3   :  { %13 = vsyncpa [#allocation4 + $0x1], 0  ;;  %s705_s12 = smov 0   ;;  %s707_s13 = smov 0  }
   0x4   :  { %s709_s14 = smov 0   ;;  %s711_s15 = smov 0  }
   0x5 LB: > { %s726_s16 = sadd.s32 4294967295, %s679_s15   ;;  %s500_s17 = sadd.s32 4294967294, %s679_s15   ;;  %s679_s15 = sphi %s711_s15, %s883_s15   ;;  %s675_s14 = sphi %s709_s14, %s882_s14   ;;  %s671_s13 = sphi %s707_s13, %s881_s13   ;;  %s667_s12 = sphi %s705_s12, %s880_s12  }
   0x6   : > { %s730_s18 = sadd.s32 1, %s679_s15   ;;  %s68_s19 = sadd.s32 1, %s675_s14 }
   0x7   : > { %s65_s20 = ssub.s32 %s679_s15, %s730_s18  ;;  %p75_p0 = scmp.ne.s32.totalorder %s675_s14, %s671_s13 }
   0x8   : > { %p66_p1 = scmp.eq.s32.totalorder %s65_s20, 0  ;;  %p76_p2 = scmp.eq.s32.totalorder %s679_s15, 0 }
   0x9   : > { %p81_p3 = scmp.ne.s32.totalorder %s671_s13, %s667_s12  ;;  %p82_p4 = scmp.eq.s32.totalorder %s726_s16, 0 }
   0xa   : > { %s742_s21 = scalar_select %p66_p1, %s675_s14, %s68_s19  }
   0xb   : > { %p744_p5 = por %p76_p2, %p75_p0  ;;  %p748_p6 = por %p82_p4, %p81_p3 }
   0xc   : > { %p105_p7 = scmp.eq.s32.totalorder %s726_s16, 1  ;;  %p111_p8 = scmp.eq.s32.totalorder %s500_s17, 1 }
   0xd   : > { %p502_p9 = scmp.ge.s32.totalorder %s679_s15, 2  ;;  %p544_p10 = scmp.lt.s32.totalorder %s679_s15, 2 }
   0xe   : > { %p755_p11 = por %p105_p7, %p75_p0  ;;  %p759_p12 = por %p111_p8, %p81_p3 }
   0xf   : > { %s137_s26 = sand.u32 1, %s675_s14   ;;  %s530_s27 = sshll.u32 %s679_s15, 6 }
  0x10   : > { %s503_s28 = sshll.u32 %s137_s26, 7  ;;  %s146_s4 = scalar_lea.hbm %s873_s2, %s530_s27 }
  0x11   : > { %s147_s5 = sshll.u32 %s146_s4, 4  ;;  %s141_s6 = scalar_lea.vmem [#allocation2], %s503_s28  ;;  %s148_s5 = int_to_ptr.hbm [resolvable:$true] %s147_s5 }
  0x12   : > { %s149_s7 = sshll.u32 %s141_s6, 4  ;;  %p770_p13 = pnand %p544_p10, %p744_p5  ;;  %s150_s7 = int_to_ptr.vmem [resolvable:$true] %s149_s7 }
  0x13   : > { %p506_p0 = scmp.ge.s32.totalorder %s679_s15, 1  ;;  %s138_s9 = scalar_lea.sflag [#allocation3], %s137_s26 }
  0x14   : > { %s583_s10 = sshra.s32 %s148_s5, 4  ;;  %p587_p2 = pneg %p770_p13  ;;  %s584_s10 = int_to_ptr.hbm [resolvable:$true] %s583_s10 }
  0x15   : > { %s585_s11 = scalar_lea.hbm %s584_s10, 128  ;;  %s590_s20 = scalar_lea.hbm %s873_s2, 256 }
  0x16   : > { %p586_p1 = scmp.ne.s32.totalorder %s584_s10, %s585_s11  ;;  %p591_p5 = scmp.lt.s32.totalorder %s584_s10, %s873_s2 }
  0x17   : > { %p592_p7 = scmp.lt.s32.totalorder %s590_s20, %s585_s11 }
  0x18   : > { %p588_p3 = pnand %p587_p2, %p586_p1 }
  0x19   : > { %p593_p8 = por %p592_p7, %p591_p5 }
  0x1a   : > { %p589_p4 = pneg %p588_p3 }
  0x1c   : > { %p594_p10 = pnand %p593_p8, %p589_p4 }
  0x1e   : > { %597 = shalt.err (!%p594_p10)
}
  0x1f   : > { %s681_s26 = smov 2048   ;;  %s682_s28 = smov 1024  }
  0x20   : > { %s683_s29 = smov 64   ;;  %p157_p1 = scmp.lt.s32.totalorder %s679_s15, 3 }
  0x21   : > { %539 = dma.hbm_to_vmem [thread:$0]  (!%p770_p13), %s148_s5, 2048, %s150_s7, %s138_s9, %s681_s26, %s682_s28, %s683_s29  }
  0x22   : > { %p158_p2 = pnand %p506_p0, %p157_p1 }
  0x23   : > { %s789_s30 = sand.u32 (!%p158_p2), 1, %s671_s13  }
  0x24   : > { %161 = sbr.rel (%p158_p2) target bundleno = 193 (0xc1), region = 32  ;;  %s507_s4 = sshll.u32 (!%p158_p2), %s789_s30, 7 }
  0x25   : > { %s164_s6 = scalar_lea.sflag (!%p158_p2), [#allocation3], %s789_s30  ;;  %s793_s10 = scalar_lea.vmem (!%p158_p2), [#allocation2], %s507_s4 }
  0x29   : > { %658 = dma.done.wait (%p748_p6), %s164_s6, 2048  }
  0x2a   : > { %660 = vsyncadd (%p748_p6), %s164_s6, 4294965248  ;;  %v684_v0 = vmov 0   ;;  %vm220_vm0 = vcmask 1041408   ;;  %v204_v1 = vld [vmem:[%s793_s10 + $0x50] sm:$0x3]  ;;  %v197_v4 = vld [vmem:[%s793_s10 + $0x18] sm:$0xff] }
  0x2b   : > { %582 = vset.pattern.permute.xlu0 %v684_v0  ;;  %v205_v2 = vld [vmem:[%s793_s10 + $0x58] sm:$0x3]  ;;  %v196_v3 = vld [vmem:[%s793_s10 + $0x10] sm:$0xff]  ;;  %513 = vmatpush.msk.msra.mxu2 %vm220_vm0, %v204_v1  ;;  %v193_v5 = vld [vmem:[%s871_s0] sm:$0x1f]  ;;  %vm216_vm1 = vcmask 80896  }
  0x2c   : > { %515 = vmatpush.msk.msra.mxu3 %vm220_vm0, %v205_v2  ;;  %v208_v6 = vld [vmem:[%s793_s10 + $0x70] sm:$0x3]  ;;  %v209_v7 = vld [vmem:[%s793_s10 + $0x78] sm:$0x3]  ;;  %v202_v8 = vld [vmem:[%s793_s10 + $0x40] sm:$0x3] }
  0x2d   : > { %300 = vmatpush.msra.mxu2 %v196_v3  ;;  %v203_v9 = vld [vmem:[%s793_s10 + $0x48] sm:$0x3]  ;;  %v200_v10 = vld [vmem:[%s793_s10 + $0x30] sm:$0xff]  ;;  %v201_v11 = vld [vmem:[%s793_s10 + $0x38] sm:$0xff]  ;;  %509 = vmatpush.msk.msra.mxu0 %vm220_vm0, %v202_v8  ;;  %s508_s9 = sshll.u32 %s789_s30, 6  ;;  %s531_s17 = sshll.u32 %s726_s16, 6 }
  0x2e   : > { %320 = vmatpush.msra.mxu3 %v197_v4  ;;  %514 = vmatmul.msk.f32.vlgmr.msra.gmra.mxu2 %vm216_vm1, %v193_v5  ;;  %v194_v12 = vld [vmem:[%s793_s10] sm:$0xff]  ;;  %v195_v13 = vld [vmem:[%s793_s10 + $0x8] sm:$0xff]  ;;  %s190_s11 = scalar_lea.vmem [#allocation5], %s508_s9  ;;  %s425_s22 = scalar_lea.hbm %s874_s3, %s531_s17 }
  0x2f   : > { %516 = vmatmul.msk.f32.vlgmr.msra.gmra.mxu3 %vm216_vm1, %v193_v5  ;;  %521 = vmatpush.msk.msrb.mxu2 %vm220_vm0, %v208_v6  ;;  %v206_v14 = vld [vmem:[%s793_s10 + $0x60] sm:$0x3]  ;;  %v207_v15 = vld [vmem:[%s793_s10 + $0x68] sm:$0x3]  ;;  %s427_s27 = sshll.u32 %s190_s11, 4  ;;  %s429_s26 = sshll.u32 %s425_s22, 4  ;;  %s428_s27 = int_to_ptr.vmem [resolvable:$true] %s427_s27  ;;  %s430_s26 = int_to_ptr.hbm [resolvable:$true] %s429_s26 }
  0x30   : > { %523 = vmatpush.msk.msrb.mxu3 %vm220_vm0, %v209_v7  ;;  %511 = vmatpush.msk.msra.mxu1 %vm220_vm0, %v203_v9  ;;  %v210_v16 = vld [vmem:[%s872_s1] sm:$0x1f]  ;;  %v199_v18 = vld [vmem:[%s793_s10 + $0x28] sm:$0xff]  ;;  %s414_s16 = scalar_lea.sflag [#allocation4], %s789_s30  ;;  %s627_s28 = sshra.s32 %s430_s26, 4  ;;  %s628_s28 = int_to_ptr.hbm [resolvable:$true] %s627_s28 }
  0x31   : > { %380 = vmatpush.msrb.mxu2 %v200_v10  ;;  %260 = vmatpush.msra.mxu0 %v194_v12  ;;  %v198_v17 = vld [vmem:[%s793_s10 + $0x20] sm:$0xff]  ;;  %s629_s29 = scalar_lea.hbm %s628_s28, 64  ;;  %s633_s10 = scalar_lea.hbm %s874_s3, 128 }
  0x32   : > { %400 = vmatpush.msrb.mxu3 %v201_v11  ;;  %280 = vmatpush.msra.mxu1 %v195_v13  ;;  %p630_p6 = scmp.ne.s32.totalorder %s628_s28, %s629_s29  ;;  %p634_p3 = scmp.lt.s32.totalorder %s628_s28, %s874_s3 }
  0x33   : > { %510 = vmatmul.msk.f32.vlgmr.msra.gmra.mxu0 %vm216_vm1, %v193_v5  ;;  %512 = vmatmul.msk.f32.vlgmr.msra.gmra.mxu1 %vm216_vm1, %v193_v5  ;;  %p635_p4 = scmp.lt.s32.totalorder %s633_s10, %s629_s29 }
  0x34   : > { %517 = vmatpush.msk.msrb.mxu0 %vm220_vm0, %v206_v14  ;;  %519 = vmatpush.msk.msrb.mxu1 %vm220_vm0, %v207_v15  ;;  %p631_p13 = pnand %p630_p6, %p755_p11 }
  0x35   : > { %213 = vperm.xlu0 %582, %v210_v16   ;;  %p636_p5 = por %p635_p4, %p634_p3 }
  0x36   : > { %522 = vmatmul.msk.f32.vlgmr.msrb.gmra.mxu2 %vm216_vm1, %v193_v5  ;;  %340 = vmatpush.msrb.mxu0 %v198_v17  ;;  %p632_p0 = pneg %p631_p13 }
  0x37   : > { %524 = vmatmul.msk.f32.vlgmr.msrb.gmra.mxu3 %vm216_vm1, %v193_v5  ;;  %360 = vmatpush.msrb.mxu1 %v199_v18 }
  0x38   : > { %p637_p7 = pnand %p636_p5, %p632_p0 }
  0x3b   : > { %518 = vmatmul.msk.f32.vlgmr.msrb.gmra.mxu0 %vm216_vm1, %v193_v5  ;;  %520 = vmatmul.msk.f32.vlgmr.msrb.gmra.mxu1 %vm216_vm1, %v193_v5 }
  0xa7   : > { %v214_v19 = vpop.permute.xlu0 %213 }
  0xb0   : > { %v262_v20 = vpop.f32.mrf.mxu0  ;;  %v282_v21 = vpop.f32.mrf.mxu1 }
  0xb1   : > { %v263_v22 = vadd.f32 %v262_v20, %v214_v19  ;;  %v283_v23 = vadd.f32 %v282_v21, %v214_v19  ;;  %v302_v24 = vpop.f32.mrf.mxu2 }
  0xb2   : > { %v322_v25 = vpop.f32.mrf.mxu3  ;;  %v303_v26 = vadd.f32 %v302_v24, %v214_v19 }
  0xb3   : > { %v323_v27 = vadd.f32 %v322_v25, %v214_v19  ;;  %405 = vst [vmem:[%s190_s11] sm:$0x1f] %v263_v22 }
  0xb4   : > { %406 = vst [vmem:[%s190_s11 + $0x8] sm:$0x1f] %v283_v23 }
  0xb5   : > { %407 = vst [vmem:[%s190_s11 + $0x10] sm:$0x1f] %v303_v26 }
  0xb6   : > { %408 = vst [vmem:[%s190_s11 + $0x18] sm:$0x1f] %v323_v27 }
  0xb8   : > { %v342_v28 = vpop.f32.mrf.mxu0  ;;  %v362_v29 = vpop.f32.mrf.mxu1 }
  0xb9   : > { %v343_v30 = vadd.f32 %v342_v28, %v214_v19  ;;  %v363_v31 = vadd.f32 %v362_v29, %v214_v19  ;;  %v382_v32 = vpop.f32.mrf.mxu2 }
  0xba   : > { %v402_v33 = vpop.f32.mrf.mxu3  ;;  %v383_v34 = vadd.f32 %v382_v32, %v214_v19 }
  0xbb   : > { %v403_v35 = vadd.f32 %v402_v33, %v214_v19  ;;  %409 = vst [vmem:[%s190_s11 + $0x20] sm:$0x1f] %v343_v30 }
  0xbc   : > { %410 = vst [vmem:[%s190_s11 + $0x28] sm:$0x1f] %v363_v31 }
  0xbd   : > { %411 = vst [vmem:[%s190_s11 + $0x30] sm:$0x1f] %v383_v34 }
  0xbe   : > { %412 = vst [vmem:[%s190_s11 + $0x38] sm:$0x1f] %v403_v35 }
  0xbf   : > { %640 = shalt.err (!%p637_p7)
}
  0xc0   : > { %534 = dma.vmem_to_hbm [thread:$0]  (%p755_p11), %s428_s27, 1024, %s430_s26, %s414_s16  }
  0xc1 PF: > { %s441_s30 = sand.u32 1, %s667_s12   ;;  %p541_p8 = pnand %p502_p9, %p759_p12 }
  0xc2   : > { %s442_s7 = scalar_lea.sflag [#allocation4], %s441_s30 }
  0xc3   : > { %p542_p10 = pneg %p541_p8 }
  0xc5   : > { %662 = dma.done.wait (%p542_p10), %s442_s7, 1024  }
  0xc6   : > { %664 = vsyncadd (%p542_p10), %s442_s7, 4294966272  ;;  %p16_p1 = scmp.ge.s32.totalorder %s730_s18, 4   ;;  %s880_s12 = smov %s671_s13 }
  0xc7   : > { %s881_s13 = smov %s675_s14  ;;  %s882_s14 = smov %s742_s21 }
  0xc8   : > { %s883_s15 = smov %s730_s18  ;;  %18 = sbr.rel (!%p16_p1) target bundleno = 5 (0x5), region = 77 }
  0xcd   :  { %448 = vsyncpa [#allocation3], 1 }
  0xce   :  { %450 = vsyncpa [#allocation3 + $0x1], 1 }
  0xcf   :  { %451 = vsyncpa [#allocation4], 1 }
  0xd0   :  { %453 = vsyncpa [#allocation4 + $0x1], 1 }

</bundles_post_ra>
